<compile_context>
chip_gen: v6e
topology: v6e:2x2x1
jax: 0.10.0
libtpu: 0.0.40
codegen_flags: <defaults>
</compile_context>

<pallas_src>
import math

import jax
import jax.numpy as jnp
from jax.experimental import pallas as pl
from jax.experimental.pallas import tpu as pltpu

_LANE = 128
_MAX_TILE_ROWS = 1024  # 1024 x 128 f32 = 512 KiB per buffer


def _dropgrad_kernel(rate_ref, x_ref, noise_ref, o_ref):
    x = x_ref[...]
    rate = rate_ref[0].astype(x.dtype)
    one = jnp.ones((), dtype=x.dtype)
    scale = one + rate * noise_ref[...]          # N(1, rate) multiplier
    o_ref[...] = x * scale


def drop_grad(x, key, rate):
    """Apply multiplicative gaussian noise: x * N(1, rate), elementwise."""
    orig_shape = x.shape
    dtype = x.dtype

    flat = x.reshape(-1)
    n = flat.shape[0]

    # Lane-dense layout: [rows, 128]. Only pad for the ragged (non-128-aligned)
    # case; aligned inputs get a pure reshape (no extra HBM pass).
    if n % _LANE == 0:
        n_pad = n
    else:
        tile = _LANE * 8
        n_pad = ((n + tile - 1) // tile) * tile
        flat = jnp.pad(flat, (0, n_pad - n))
    rows = n_pad // _LANE
    x2d = flat.reshape(rows, _LANE)

    # Fresh N(0,1) noise in the input dtype (bf16 inputs keep bf16 noise,
    # halving HBM bytes for this memory-bound op).
    noise2d = jax.random.normal(key, (rows, _LANE), dtype=dtype)

    # Tile rows; TR is either the full row extent or a multiple of 8.
    tr = rows if rows <= _MAX_TILE_ROWS else _MAX_TILE_ROWS
    grid = (pl.cdiv(rows, tr),)

    rate_arr = jnp.asarray([rate], dtype=jnp.float32)
    imap = lambda i, rate_ref: (i, 0)

    out2d = pl.pallas_call(
        _dropgrad_kernel,
        out_shape=jax.ShapeDtypeStruct((rows, _LANE), dtype),
        grid_spec=pltpu.PrefetchScalarGridSpec(
            num_scalar_prefetch=1,                  # cur_rate lives in SMEM
            grid=grid,
            in_specs=[
                pl.BlockSpec((tr, _LANE), imap),    # x tile
                pl.BlockSpec((tr, _LANE), imap),    # noise tile
            ],
            out_specs=pl.BlockSpec((tr, _LANE), imap),
        ),
        compiler_params=pltpu.CompilerParams(
            dimension_semantics=("parallel",)),     # shard tiles across TCs
    )(rate_arr, x2d, noise2d)

    if n_pad != n:
        return out2d.reshape(-1)[:n].reshape(orig_shape)
    return out2d.reshape(orig_shape)


class DropGrad:
    """JAX/Pallas port of the PyTorch DropGrad module (gaussian method)."""

    def __init__(self, rate=0.1, schedule="constant"):
        self.method = "gaussian"
        self.rate = rate if self.method != "gaussian" else math.sqrt(rate / (1 - rate))
        self.schedule = schedule
        self.cur_rate = self.rate

    def update_rate(self, epoch, stop_epoch):
        if self.schedule == "constant":
            self.cur_rate = self.rate
        elif self.schedule == "linear":
            self.cur_rate = self.rate * epoch / (stop_epoch - 1)

    def __call__(self, x, key):
        return drop_grad(x, key, self.cur_rate)


if __name__ == "__main__":
    key = jax.random.PRNGKey(0)
    kx, knoise = jax.random.split(key)
    x = jax.random.normal(kx, (2, 4, 16, 16), dtype=jnp.float32)

    module = DropGrad(rate=0.1, schedule="constant")
    out = module(x, knoise)
    out = jax.block_until_ready(out)

    assert out.shape == x.shape
    assert out.dtype == x.dtype

    # Sanity: output differs from input (noise applied), stays finite, and the
    # multiplicative structure holds (out/x has mean ~1, std ~cur_rate).
    assert not bool(jnp.allclose(out, x)), "noise was not applied"
    assert bool(jnp.all(jnp.isfinite(out)))

    print("KERNEL_OK")
</pallas_src>

<mosaic_0001>
module attributes {stable_mosaic.version = 11 : i64} {
  func.func @_dropgrad_kernel(%arg0: i32, %arg1: memref<1xf32, #tpu.memory_space<smem>>, %arg2: memref<16x128xf32, #tpu.memory_space<vmem>>, %arg3: memref<16x128xf32, #tpu.memory_space<vmem>>, %arg4: memref<16x128xf32, #tpu.memory_space<vmem>>) attributes {dimension_semantics = [#tpu.dimension_semantics<parallel>], iteration_bounds = array<i64: 1>, scalar_prefetch = 1 : i64, scratch_operands = 0 : i64, tpu.core_type = #tpu.core_type<tc>, window_params = [{transform_indices = @transform_0, window_bounds = array<i64: 16, 128>}, {transform_indices = @transform_1, window_bounds = array<i64: 16, 128>}, {transform_indices = @transform_2, window_bounds = array<i64: 16, 128>}]} {
    %c0 = arith.constant 0 : index
    %c0_0 = arith.constant 0 : index
    %0 = vector.load %arg2[%c0, %c0_0] : memref<16x128xf32, #tpu.memory_space<vmem>>, vector<16x128xf32>
    %c0_1 = arith.constant 0 : index
    %1 = memref.load %arg1[%c0_1] : memref<1xf32, #tpu.memory_space<smem>>
    %c0_2 = arith.constant 0 : index
    %c0_3 = arith.constant 0 : index
    %2 = vector.load %arg3[%c0_2, %c0_3] : memref<16x128xf32, #tpu.memory_space<vmem>>, vector<16x128xf32>
    %3 = vector.broadcast %1 : f32 to vector<16x128xf32>
    %4 = arith.mulf %3, %2 : vector<16x128xf32>
    %cst = arith.constant 1.000000e+00 : f32
    %5 = vector.broadcast %cst : f32 to vector<16x128xf32>
    %6 = arith.addf %5, %4 : vector<16x128xf32>
    %7 = arith.mulf %0, %6 : vector<16x128xf32>
    %c0_4 = arith.constant 0 : index
    %c0_5 = arith.constant 0 : index
    %8 = vector.load %arg4[%c0_4, %c0_5] : memref<16x128xf32, #tpu.memory_space<vmem>>, vector<16x128xf32>
    tpu.vector_store %arg4[%c0_4, %c0_5], %7 {strides = array<i32>} : memref<16x128xf32, #tpu.memory_space<vmem>>, vector<16x128xf32>,
    return
  }
  func.func @transform_0(%arg0: i32, %arg1: memref<1xf32, #tpu.memory_space<smem>>) -> (i32, i32) {
    %c0_i32 = arith.constant 0 : i32
    %c0_i32_0 = arith.constant 0 : i32
    return %arg0, %c0_i32 : i32, i32
  }
  func.func @transform_1(%arg0: i32, %arg1: memref<1xf32, #tpu.memory_space<smem>>) -> (i32, i32) {
    %c0_i32 = arith.constant 0 : i32
    %c0_i32_0 = arith.constant 0 : i32
    return %arg0, %c0_i32 : i32, i32
  }
  func.func @transform_2(%arg0: i32, %arg1: memref<1xf32, #tpu.memory_space<smem>>) -> (i32, i32) {
    %c0_i32 = arith.constant 0 : i32
    %c0_i32_0 = arith.constant 0 : i32
    return %arg0, %c0_i32 : i32, i32
  }
}

</mosaic_0001>

<bundles_post_ra>
// kernel: tpu_custom_call.1
= control target key start
LH: loop header
LB: loop body
LE: loop exit
PB: predicated region body
PF: predicated region fallthrough
CT: control target
= control target key end

     0   :  { %9 = vsyncpa [#allocation5], 0  ;;  %s191_s0 = inlined_call_operand.<no memory space> [shape: f32[1], index: 0, kind: input, shape index: {}]   ;;  %s192_s1 = inlined_call_operand.hbm [shape: f32[16,128], index: 1, kind: input, shape index: {}]   ;;  %s193_s2 = inlined_call_operand.hbm [shape: f32[16,128], index: 2, kind: input, shape index: {}]   ;;  %s194_s3 = inlined_call_operand.hbm [shape: f32[16,128], index: 3, kind: output, shape index: {}]  }
   0x1   :  { %10 = vsyncpa [#allocation8], 0 }
   0x2   :  { %11 = vsyncpa [#allocation6], 0  ;;  %s145_s12 = smov [#allocation4]  }
   0x3   :  { %s17_s13 = sshll.u32 %s145_s12, 4  ;;  %s18_s13 = int_to_ptr.vmem [resolvable:$true] %s17_s13 }
   0x4   :  { %s87_s14 = scalar_lea.vmem %s18_s13, 256  ;;  %p92_p1 = scmp.lt.s32.totalorder %s18_s13, %s18_s13 }
   0x5   :  { %p88_p0 = scmp.ne.s32.totalorder %s18_s13, %s87_s14  ;;  %p93_p2 = scmp.lt.s32.totalorder %s87_s14, %s87_s14 }
   0x7   :  { %p94_p3 = por %p93_p2, %p92_p1 }
   0x9   :  { %p95_p4 = pnand %p94_p3, %p88_p0 }
   0xb   :  { %98 = shalt.err (!%p95_p4)
}
   0xc   :  { %s146_s15 = smov 128   ;;  %s147_s16 = smov 8  }
   0xd   :  { %23 = dma.hbm_to_vmem [thread:$0]  %s192_s1, 256, %s18_s13, [#allocation5], %s146_s15, %s146_s15, %s147_s16  }
   0xe   :  { %s148_s19 = smov [#allocation7]  }
   0xf   :  { %s29_s20 = sshll.u32 %s148_s19, 4  ;;  %s30_s20 = int_to_ptr.vmem [resolvable:$true] %s29_s20 }
  0x10   :  { %s107_s21 = scalar_lea.vmem %s30_s20, 256  ;;  %p112_p6 = scmp.lt.s32.totalorder %s30_s20, %s30_s20 }
  0x11   :  { %p108_p5 = scmp.ne.s32.totalorder %s30_s20, %s107_s21  ;;  %p113_p7 = scmp.lt.s32.totalorder %s107_s21, %s107_s21 }
  0x13   :  { %p114_p8 = por %p113_p7, %p112_p6 }
  0x15   :  { %p115_p9 = pnand %p114_p8, %p108_p5 }
  0x17   :  { %118 = shalt.err (!%p115_p9)
}
  0x18   :  { %35 = dma.hbm_to_vmem [thread:$0]  %s193_s2, 256, %s30_s20, [#allocation8], %s146_s15, %s146_s15, %s147_s16  }
  0x19   :  { %139 = dma.done.wait [#allocation5], 256  }
  0x1a   :  { %140 = vsyncadd [#allocation5], 4294967040 }
  0x1b   :  { %141 = dma.done.wait [#allocation8], 256  }
  0x1c   :  { %142 = vsyncadd [#allocation8], 4294967040  ;;  %v47_v0 = vstv %s191_s0  ;;  %v45_v1 = vld [vmem:[#allocation7] sm:$0xff]  ;;  %v46_v3 = vld [vmem:[#allocation7 + $0x8] sm:$0xff]  ;;  %s149_s25 = smov [#allocation9]  }
  0x1d   :  { %v48_v2 = vmul.f32 %v47_v0, %v45_v1  ;;  %v42_v4 = vld [vmem:[#allocation4] sm:$0xff]  ;;  %v49_v5 = vmul.f32 %v47_v0, %v46_v3  ;;  %v43_v7 = vld [vmem:[#allocation4 + $0x8] sm:$0xff]  ;;  %s61_s26 = sshll.u32 %s149_s25, 4  ;;  %s62_s26 = int_to_ptr.vmem [resolvable:$true] %s61_s26 }
  0x1e   :  { %s119_s2 = scalar_lea.vmem %s62_s26, 256  ;;  %p124_p11 = scmp.lt.s32.totalorder %s62_s26, %s62_s26 }
  0x1f   :  { %v50_v6 = vadd.f32 1.0, %v48_v2  ;;  %v51_v8 = vadd.f32 1.0, %v49_v5  ;;  %p120_p10 = scmp.ne.s32.totalorder %s62_s26, %s119_s2  ;;  %p125_p12 = scmp.lt.s32.totalorder %s119_s2, %s119_s2 }
  0x21   :  { %v52_v9 = vmul.f32 %v50_v6, %v42_v4  ;;  %v53_v10 = vmul.f32 %v51_v8, %v43_v7  ;;  %p126_p13 = por %p125_p12, %p124_p11 }
  0x23   :  { %54 = vst [vmem:[#allocation9] sm:$0xff] %v52_v9  ;;  %55 = vst [vmem:[#allocation9 + $0x8] sm:$0xff] %v53_v10  ;;  %p127_p0 = pnand %p126_p13, %p120_p10 }
  0x25   :  { %130 = shalt.err (!%p127_p0)
}
  0x26   :  { %67 = dma.vmem_to_hbm [thread:$0]  %s62_s26, 256, %s194_s3, [#allocation6], %s146_s15, %s146_s15, %s147_s16  }
  0x27   :  { %143 = dma.done.wait [#allocation6], 256  }
  0x28   :  { %144 = vsyncadd [#allocation6], 4294967040 }
  0x29   :  { %71 = vsyncpa [#allocation5], 1 }
  0x2a   :  { %72 = vsyncpa [#allocation8], 1 }
  0x2b   :  { %73 = vsyncpa [#allocation6], 1 }

</bundles_post_ra>
